<compile_context>
chip_gen: v6e
topology: v6e:2x2x1
jax: 0.10.0
libtpu: 0.0.40
codegen_flags: <defaults>
</compile_context>

<pallas_src>
import itertools
from functools import partial

import jax
import jax.numpy as jnp
from jax import lax
from jax.experimental import pallas as pl
from jax.experimental.pallas import tpu as pltpu


def _round_up(n, m):
    return ((n + m - 1) // m) * m


def _tile_and_pad(n, target=8192):
    """Choose a lane-aligned N-tile and the padded N it divides.

    Per-grid-step overhead is ~0.35us, so prefer the biggest tile <= target that
    keeps padding small.  Returns (tile_n, padded_n) with tile_n % 128 == 0 and
    padded_n % tile_n == 0.
    """
    target = max(128, (target // 128) * 128)
    n128 = _round_up(n, 128)
    if n128 <= target:
        return n128, n128
    best = 128
    for t in range(target, 127, -128):
        if n128 % t == 0:
            best = t
            break
    if best >= 1024:
        return best, n128
    # Awkward N (only tiny divisors): pad up to a multiple of the target tile instead.
    return target, _round_up(n, target)


def _pad_last(x, n_pad, value=0):
    n = x.shape[-1]
    if n == n_pad:
        return x
    widths = [(0, 0)] * (x.ndim - 1) + [(0, n_pad - n)]
    return jnp.pad(x, widths, constant_values=value)


# --------------------------------------------------------------------------
# Deep-clustering loss
#   cost_b = ||V^T V||_F^2 + ||Y^T Y||_F^2 - 2 ||V^T Y||_F^2   (VAD-masked)
#   dc_loss_b = cost_b / sum(mask_b)
# Implemented as one fused Gram matrix G = M M^T accumulated over N-tiles,
# with M rows = [masked embedding (D) ; masked one-hot (S) ; mask (1)].
# --------------------------------------------------------------------------
def _dc_cost_from_gram(g, d, n_src):
    """sum(Gvv^2) + sum(Gyy^2) - 2*sum(Gvy^2) from the fused (padded) Gram matrix."""
    kk = g.shape[0]
    row = lax.broadcasted_iota(jnp.int32, (kk, kk), 0)
    col = lax.broadcasted_iota(jnp.int32, (kk, kk), 1)
    v_r, v_c = row < d, col < d
    y_r = (row >= d) & (row < d + n_src)
    y_c = (col >= d) & (col < d + n_src)
    w = (jnp.where(v_r & v_c, 1.0, 0.0) + jnp.where(y_r & y_c, 1.0, 0.0)
         - jnp.where(v_r & y_c, 1.0, 0.0) - jnp.where(y_r & v_c, 1.0, 0.0))
    return jnp.sum(w * g * g)


def _dc_loss_kernel_vad(thr_ref, emb_ref, tgt_ref, mix_ref, out_ref, g_ref, *, n_src):
    k = pl.program_id(1)

    @pl.when(k == 0)
    def _():
        g_ref[...] = jnp.zeros_like(g_ref)

    emb = emb_ref[0].astype(jnp.float32)               # (D, TN)   TF bins on lanes
    tgt = tgt_ref[0]                                   # (1, TN)   int32
    mix = mix_ref[0].astype(jnp.float32)               # (1, TN)
    d, tn = emb.shape

    src_ids = lax.broadcasted_iota(jnp.int32, (n_src, tn), 0)
    onehot = (tgt == src_ids).astype(jnp.float32)      # (S, TN)  one-hot (replaces scatter_)
    mask = (mix > thr_ref[0, 0]).astype(jnp.float32)   # (1, TN)  linear-domain ebased_vad

    # Fused Gram: one MXU stream per tile; f32 accumulation in VMEM scratch.
    m = jnp.concatenate([emb, onehot, jnp.ones((1, tn), jnp.float32)], axis=0) * mask
    g_ref[...] += lax.dot_general(m, m, (((1,), (1,)), ((), ())),
                                  preferred_element_type=jnp.float32)

    @pl.when(k == pl.num_programs(1) - 1)
    def _():
        g = g_ref[...]
        cost = _dc_cost_from_gram(g, d, n_src)
        kk = g.shape[0]
        row = lax.broadcasted_iota(jnp.int32, (kk, kk), 0)
        col = lax.broadcasted_iota(jnp.int32, (kk, kk), 1)
        # G[last, last] = sum(mask^2) = sum(mask) for a binary mask.
        n_active = jnp.sum(jnp.where((row == kk - 1) & (col == kk - 1), g, 0.0))
        out_ref[...] = jnp.reshape(cost / jnp.maximum(n_active, 1.0), (1, 1, 1))


def _dc_loss_kernel_novad(emb_ref, tgt_ref, out_ref, g_ref, *, n_src, n_bins):
    k = pl.program_id(1)

    @pl.when(k == 0)
    def _():
        g_ref[...] = jnp.zeros_like(g_ref)

    emb = emb_ref[0].astype(jnp.float32)               # (D, TN)
    tgt = tgt_ref[0]                                   # (1, TN)
    d, tn = emb.shape

    src_ids = lax.broadcasted_iota(jnp.int32, (n_src, tn), 0)
    onehot = (tgt == src_ids).astype(jnp.float32)      # (S, TN)

    m = jnp.concatenate([emb, onehot], axis=0)
    g_ref[...] += lax.dot_general(m, m, (((1,), (1,)), ((), ())),
                                  preferred_element_type=jnp.float32)

    @pl.when(k == pl.num_programs(1) - 1)
    def _():
        cost = _dc_cost_from_gram(g_ref[...], d, n_src)
        out_ref[...] = jnp.reshape(cost / n_bins, (1, 1, 1))


def deep_clustering_loss(est_embeddings, target_indices, mix_spec=None, *,
                         n_src, th_db=40.0, tile_n=8192):
    B, N, D = est_embeddings.shape
    # Layout plumbing (wrapper side): TF bins on the lane axis for every input.
    # TODO(synk): the (B,N,D)->(B,D,N) transpose is one extra HBM pass over the largest
    # array; a sublane-contracting Gram could avoid it at the cost of lane-sparse DMAs.
    emb_t = jnp.swapaxes(est_embeddings, 1, 2)                  # (B, D, N), keeps dtype (bf16 ok)
    tgt = target_indices.reshape(B, 1, N).astype(jnp.int32)     # (B, 1, N) lane-dense

    tn, n_pad = _tile_and_pad(N, tile_n)
    emb_t = _pad_last(emb_t, n_pad)                             # zero cols: inert in the Gram
    tgt = _pad_last(tgt, n_pad, value=-1)                       # -1: one-hot rows all zero

    grid = (B, n_pad // tn)
    emb_spec = pl.BlockSpec((1, D, tn), lambda b, k: (b, 0, k))
    vec_spec = pl.BlockSpec((1, 1, tn), lambda b, k: (b, 0, k))
    out_spec = pl.BlockSpec((1, 1, 1), lambda b, k: (b, 0, 0))
    out_shape = jax.ShapeDtypeStruct((B, 1, 1), jnp.float32)
    cparams = pltpu.CompilerParams(dimension_semantics=("parallel", "arbitrary"))

    if mix_spec is not None:
        mix = mix_spec.reshape(B, 1, N)
        # ebased_vad in linear domain (global max, as in asteroid): mix > max * 10^(-th_db/20)
        thr = (jnp.max(mix).astype(jnp.float32)
               * jnp.float32(10.0 ** (-th_db / 20.0))).reshape(1, 1)
        mix = _pad_last(mix, n_pad, value=jnp.finfo(mix.dtype).min)  # padded bins fail the VAD
        out = pl.pallas_call(
            partial(_dc_loss_kernel_vad, n_src=n_src),
            out_shape=out_shape,
            grid=grid,
            in_specs=[
                pl.BlockSpec(memory_space=pltpu.MemorySpace.SMEM),   # VAD threshold scalar
                emb_spec, vec_spec, vec_spec,
            ],
            out_specs=out_spec,
            scratch_shapes=[pltpu.VMEM((D + n_src + 1, D + n_src + 1), jnp.float32)],
            compiler_params=cparams,
        )(thr, emb_t, tgt, mix)
    else:
        # No-VAD: no ones-mask array is synthesized or DMA'd; divide by the real N statically.
        out = pl.pallas_call(
            partial(_dc_loss_kernel_novad, n_src=n_src, n_bins=float(N)),
            out_shape=out_shape,
            grid=grid,
            in_specs=[emb_spec, vec_spec],
            out_specs=out_spec,
            scratch_shapes=[pltpu.VMEM((D + n_src, D + n_src), jnp.float32)],
            compiler_params=cparams,
        )(emb_t, tgt)
    return out.reshape(B)


# --------------------------------------------------------------------------
# Pairwise MSE:  pw[b, i, j] = mean_n (target[b, j, n] - est[b, i, n])^2
#              = (sum_n e_i^2 + sum_n t_j^2 - 2 sum_n e_i t_j) / N
# One Gram matmul of M = [est ; tgt] per N-tile, accumulated in f32 scratch.
# --------------------------------------------------------------------------
def _pairwise_mse_kernel(est_ref, tgt_ref, out_ref, g_ref, *, inv_n):
    k = pl.program_id(1)

    @pl.when(k == 0)
    def _():
        g_ref[...] = jnp.zeros_like(g_ref)

    e = est_ref[0].astype(jnp.float32)                 # (S, TN)
    t = tgt_ref[0].astype(jnp.float32)                 # (S, TN)
    s = e.shape[0]
    m = jnp.concatenate([e, t], axis=0)                # (2S, TN)
    g_ref[...] += lax.dot_general(m, m, (((1,), (1,)), ((), ())),
                                  preferred_element_type=jnp.float32)

    @pl.when(k == pl.num_programs(1) - 1)
    def _():
        g = g_ref[...]                                 # (2S, 2S)
        ii = lax.broadcasted_iota(jnp.int32, (s, s), 0)
        jj = lax.broadcasted_iota(jnp.int32, (s, s), 1)
        eye = (ii == jj).astype(jnp.float32)
        e2_col = jnp.sum(g[:s, :s] * eye, axis=1, keepdims=True)   # (S, 1): sum_n e_i^2
        t2_row = jnp.sum(g[s:, s:] * eye, axis=0, keepdims=True)   # (1, S): sum_n t_j^2
        cross = g[:s, s:]                                          # (S, S): sum_n e_i t_j
        out_ref[0] = (e2_col + t2_row - 2.0 * cross) * inv_n


def pairwise_mse(est_src, target_src, *, tile_n=8192):
    B, S = est_src.shape[:2]
    N = 1
    for d in est_src.shape[2:]:
        N *= d
    est = est_src.reshape(B, S, N)                     # keep input dtype (bf16 ok)
    tgt = target_src.reshape(B, S, N)
    tn, n_pad = _tile_and_pad(N, tile_n)
    est = _pad_last(est, n_pad)                        # zero cols add nothing to any sum
    tgt = _pad_last(tgt, n_pad)
    return pl.pallas_call(
        partial(_pairwise_mse_kernel, inv_n=1.0 / N),
        out_shape=jax.ShapeDtypeStruct((B, S, S), jnp.float32),
        grid=(B, n_pad // tn),
        in_specs=[
            pl.BlockSpec((1, S, tn), lambda b, k: (b, 0, k)),
            pl.BlockSpec((1, S, tn), lambda b, k: (b, 0, k)),
        ],
        out_specs=pl.BlockSpec((1, S, S), lambda b, k: (b, 0, 0)),
        scratch_shapes=[pltpu.VMEM((2 * S, 2 * S), jnp.float32)],
        compiler_params=pltpu.CompilerParams(
            dimension_semantics=("parallel", "arbitrary")),
    )(est, tgt)


def pit_from_pw_mtx(pw):
    """PITLossWrapper(pit_from='pw_mtx'): min over permutations, then mean over batch."""
    _, S, _ = pw.shape
    perm_losses = []
    for perm in itertools.permutations(range(S)):
        perm_losses.append(sum(pw[:, perm[i], i] for i in range(S)) / S)
    loss_set = jnp.stack(perm_losses, axis=-1)         # (B, S!)
    return jnp.mean(jnp.min(loss_set, axis=-1))


# --------------------------------------------------------------------------
# ChimeraLoss
# --------------------------------------------------------------------------
class ChimeraLoss:
    def __init__(self, alpha=0.1):
        assert alpha >= 0, "Negative alpha values don't make sense."
        assert alpha <= 1, "Alpha values above 1 don't make sense."
        self.alpha = alpha

    def __call__(self, est_embeddings, target_indices, est_src=None,
                 target_src=None, mix_spec=None):
        if self.alpha != 0 and (est_src is None or target_src is None):
            raise ValueError(
                "Expected target and estimated spectrograms to compute the PIT loss, found None."
            )
        if est_src is not None:
            n_src = est_src.shape[1]
        else:
            # TODO(synk): reference uses data-dependent spk_cnt = len(tgt_index.unique());
            # here it is concretized from the targets (not jit-able) when est_src is absent.
            n_src = int(jnp.max(target_indices)) + 1

        dc_loss = deep_clustering_loss(est_embeddings, target_indices, mix_spec, n_src=n_src)
        dc_mean = jnp.mean(dc_loss)

        if est_src is not None and target_src is not None:
            pw = pairwise_mse(est_src, target_src)
            src_pit_loss = pit_from_pw_mtx(pw)
        else:
            src_pit_loss = jnp.zeros((), jnp.float32)

        tot = self.alpha * dc_mean + (1.0 - self.alpha) * src_pit_loss
        return tot, dict(dc_loss=dc_mean, pit_loss=src_pit_loss)


# --------------------------------------------------------------------------
# Pure-JAX reference (mirrors the asteroid forward) for a numerical sanity check.
# --------------------------------------------------------------------------
def _reference_dc(est_embeddings, target_indices, n_src, mix_spec=None, th_db=40.0):
    B, N, D = est_embeddings.shape
    emb = est_embeddings.astype(jnp.float32)                      # (B, N, D)
    onehot = jax.nn.one_hot(target_indices.reshape(B, N), n_src, dtype=jnp.float32)
    if mix_spec is not None:
        mix = mix_spec.reshape(B, N).astype(jnp.float32)
        thr = jnp.max(mix) * jnp.float32(10.0 ** (-th_db / 20.0))
        mask = (mix > thr).astype(jnp.float32)[..., None]         # (B, N, 1)
    else:
        mask = jnp.ones((B, N, 1), jnp.float32)
    v = emb * mask
    y = onehot * mask
    vtv = jnp.einsum('bnd,bne->bde', v, v)
    yty = jnp.einsum('bns,bnt->bst', y, y)
    vty = jnp.einsum('bnd,bns->bds', v, y)
    cost = (jnp.sum(vtv ** 2, axis=(1, 2)) + jnp.sum(yty ** 2, axis=(1, 2))
            - 2.0 * jnp.sum(vty ** 2, axis=(1, 2)))
    return cost / jnp.maximum(jnp.sum(mask, axis=(1, 2)), 1.0)


def _reference_chimera(est_embeddings, target_indices, est_src, target_src,
                       mix_spec, alpha, th_db=40.0):
    B, S = est_src.shape[:2]
    N = est_embeddings.shape[1]
    dc = _reference_dc(est_embeddings, target_indices, S, mix_spec, th_db)
    e = est_src.reshape(B, S, N).astype(jnp.float32)
    t = target_src.reshape(B, S, N).astype(jnp.float32)
    pw = jnp.mean((t[:, None, :, :] - e[:, :, None, :]) ** 2, axis=-1)
    pit = pit_from_pw_mtx(pw)
    dc_mean = jnp.mean(dc)
    return alpha * dc_mean + (1.0 - alpha) * pit, dc_mean, pit


if __name__ == "__main__":
    # N = F*T = 150 is deliberately NOT a multiple of 128 to exercise the padding path.
    B, S, F, T, D = 2, 2, 15, 10, 16      # batch, sources, freq bins, frames, embed dim
    N = F * T

    key = jax.random.PRNGKey(0)
    k1, k2, k3, k4, k5 = jax.random.split(key, 5)
    # Heavy arrays in bf16 (as a TPU network would emit them); kernels accumulate in f32.
    est_embeddings = jax.nn.sigmoid(jax.random.normal(k1, (B, N, D))).astype(jnp.bfloat16)
    target_indices = jax.random.randint(k2, (B, F, T), 0, S, dtype=jnp.int32)
    est_src = jnp.abs(jax.random.normal(k3, (B, S, F, T))).astype(jnp.bfloat16)
    target_src = jnp.abs(jax.random.normal(k4, (B, S, F, T))).astype(jnp.bfloat16)
    mix_spec = jnp.abs(jax.random.normal(k5, (B, F, T))) + 1e-3

    loss_fn = ChimeraLoss(alpha=0.1)
    tot, loss_dict = loss_fn(est_embeddings, target_indices, est_src, target_src, mix_spec)
    tot = jax.block_until_ready(tot)
    jax.block_until_ready(loss_dict["dc_loss"])
    jax.block_until_ready(loss_dict["pit_loss"])
    assert jnp.isfinite(tot)

    # VAD path check against the pure-JAX reference.
    tot_ref, dc_ref, pit_ref = _reference_chimera(
        est_embeddings, target_indices, est_src, target_src, mix_spec, alpha=0.1)
    assert jnp.allclose(loss_dict["dc_loss"], dc_ref, rtol=5e-3, atol=1e-4), \
        (loss_dict["dc_loss"], dc_ref)
    assert jnp.allclose(loss_dict["pit_loss"], pit_ref, rtol=5e-3, atol=1e-4), \
        (loss_dict["pit_loss"], pit_ref)
    assert jnp.allclose(tot, tot_ref, rtol=5e-3, atol=1e-4), (tot, tot_ref)

    # No-VAD kernel variant check (mix_spec=None path).
    dc_novad = jax.block_until_ready(
        deep_clustering_loss(est_embeddings, target_indices, None, n_src=S))
    dc_novad_ref = _reference_dc(est_embeddings, target_indices, S, None)
    assert jnp.allclose(dc_novad, dc_novad_ref, rtol=5e-3, atol=1e-4), \
        (dc_novad, dc_novad_ref)

    print("KERNEL_OK")
</pallas_src>

<mosaic_0001>
module attributes {stable_mosaic.version = 11 : i64} {
  func.func @_dc_loss_kernel_vad(%arg0: i32, %arg1: i32, %arg2: memref<1x1xf32, #tpu.memory_space<smem>>, %arg3: memref<1x16x256xbf16, #tpu.memory_space<vmem>>, %arg4: memref<1x1x256xi32, #tpu.memory_space<vmem>>, %arg5: memref<1x1x256xf32, #tpu.memory_space<vmem>>, %arg6: memref<1x1x1xf32, #tpu.memory_space<vmem>>, %arg7: memref<19x19xf32, #tpu.memory_space<vmem>>) attributes {dimension_semantics = [#tpu.dimension_semantics<parallel>, #tpu.dimension_semantics<arbitrary>], iteration_bounds = array<i64: 2, 1>, scalar_prefetch = 0 : i64, scratch_operands = 1 : i64, tpu.core_type = #tpu.core_type<tc>, window_params = [{transform_indices = @transform_0, window_bounds = array<i64: 1, 1>}, {transform_indices = @transform_1, window_bounds = array<i64: 1, 16, 256>}, {transform_indices = @transform_2, window_bounds = array<i64: 1, 1, 256>}, {transform_indices = @transform_3, window_bounds = array<i64: 1, 1, 256>}, {transform_indices = @transform_4, window_bounds = array<i64: 1, 1, 1>}]} {
    %c0_i32 = arith.constant 0 : i32
    %0 = arith.cmpi eq, %arg1, %c0_i32 : i32
    %1 = arith.extui %0 : i1 to i32
    %c0_i32_0 = arith.constant 0 : i32
    %2 = arith.cmpi ne, %1, %c0_i32_0 : i32
    scf.if %2 {
      %cst_18 = arith.constant 0.000000e+00 : f32
      %31 = vector.broadcast %cst_18 : f32 to vector<19x19xf32>
      %c0_19 = arith.constant 0 : index
      %c0_20 = arith.constant 0 : index
      %32 = vector.load %arg7[%c0_19, %c0_20] : memref<19x19xf32, #tpu.memory_space<vmem>>, vector<19x19xf32>
      tpu.vector_store %arg7[%c0_19, %c0_20], %31 {strides = array<i32>} : memref<19x19xf32, #tpu.memory_space<vmem>>, vector<19x19xf32>,
    } else {
    }
    %c0 = arith.constant 0 : index
    %c0_1 = arith.constant 0 : index
    %c0_2 = arith.constant 0 : index
    %3 = vector.load %arg3[%c0, %c0_1, %c0_2] : memref<1x16x256xbf16, #tpu.memory_space<vmem>>, vector<1x16x256xbf16>
    %4 = vector.shape_cast %3 : vector<1x16x256xbf16> to vector<16x256xbf16>
    %5 = arith.extf %4 : vector<16x256xbf16> to vector<16x256xf32>
    %c0_3 = arith.constant 0 : index
    %c0_4 = arith.constant 0 : index
    %c0_5 = arith.constant 0 : index
    %6 = vector.load %arg4[%c0_3, %c0_4, %c0_5] : memref<1x1x256xi32, #tpu.memory_space<vmem>>, vector<1x1x256xi32>
    %7 = vector.shape_cast %6 : vector<1x1x256xi32> to vector<1x256xi32>
    %c0_6 = arith.constant 0 : index
    %c0_7 = arith.constant 0 : index
    %c0_8 = arith.constant 0 : index
    %8 = vector.load %arg5[%c0_6, %c0_7, %c0_8] : memref<1x1x256xf32, #tpu.memory_space<vmem>>, vector<1x1x256xf32>
    %9 = vector.shape_cast %8 : vector<1x1x256xf32> to vector<1x256xf32>
    %10 = tpu.iota {dimensions = array<i32: 0>} : vector<2x256xi32>
    %11 = vector.broadcast %7 : vector<1x256xi32> to vector<2x256xi32>
    %12 = arith.cmpi eq, %11, %10 : vector<2x256xi32>
    %13 = arith.extui %12 : vector<2x256xi1> to vector<2x256xi32>
    %14 = arith.sitofp %13 : vector<2x256xi32> to vector<2x256xf32>
    %c0_9 = arith.constant 0 : index
    %c0_10 = arith.constant 0 : index
    %15 = memref.load %arg2[%c0_9, %c0_10] : memref<1x1xf32, #tpu.memory_space<smem>>
    %16 = vector.broadcast %15 : f32 to vector<1x256xf32>
    %17 = arith.cmpf ogt, %9, %16 : vector<1x256xf32>
    %18 = arith.extui %17 : vector<1x256xi1> to vector<1x256xi32>
    %19 = arith.sitofp %18 : vector<1x256xi32> to vector<1x256xf32>
    %cst = arith.constant 1.000000e+00 : f32
    %20 = vector.broadcast %cst : f32 to vector<1x256xf32>
    %21 = tpu.concatenate %5, %14, %20 in 0 : vector<16x256xf32>, vector<2x256xf32>, vector<1x256xf32> -> vector<19x256xf32>
    %22 = vector.broadcast %19 : vector<1x256xf32> to vector<19x256xf32>
    %23 = arith.mulf %21, %22 : vector<19x256xf32>
    %c0_11 = arith.constant 0 : index
    %c0_12 = arith.constant 0 : index
    %24 = vector.load %arg7[%c0_11, %c0_12] : memref<19x19xf32, #tpu.memory_space<vmem>>, vector<19x19xf32>
    %cst_13 = arith.constant dense<0.000000e+00> : vector<19x19xf32>
    %25 = tpu.matmul %23, %23, %cst_13 {dimension_numbers = #tpu.dot_dimension_numbers<[1], [1], [0], [0], [0, 0, 1, 0], [], []>} : vector<19x256xf32>, vector<19x256xf32>, vector<19x19xf32> -> vector<19x19xf32>
    %26 = arith.addf %24, %25 : vector<19x19xf32>
    %c0_14 = arith.constant 0 : index
    %c0_15 = arith.constant 0 : index
    %27 = vector.load %arg7[%c0_14, %c0_15] : memref<19x19xf32, #tpu.memory_space<vmem>>, vector<19x19xf32>
    tpu.vector_store %arg7[%c0_14, %c0_15], %26 {strides = array<i32>} : memref<19x19xf32, #tpu.memory_space<vmem>>, vector<19x19xf32>,
    %c0_i32_16 = arith.constant 0 : i32
    %28 = arith.cmpi eq, %arg1, %c0_i32_16 : i32
    %29 = arith.extui %28 : i1 to i32
    %c0_i32_17 = arith.constant 0 : i32
    %30 = arith.cmpi ne, %29, %c0_i32_17 : i32
    scf.if %30 {
      %c0_18 = arith.constant 0 : index
      %c0_19 = arith.constant 0 : index
      %31 = vector.load %arg7[%c0_18, %c0_19] : memref<19x19xf32, #tpu.memory_space<vmem>>, vector<19x19xf32>
      %32 = tpu.iota {dimensions = array<i32: 0>} : vector<19x19xi32>
      %33 = tpu.iota {dimensions = array<i32: 1>} : vector<19x19xi32>
      %c16_i32 = arith.constant 16 : i32
      %34 = vector.broadcast %c16_i32 : i32 to vector<19x19xi32>
      %35 = arith.cmpi slt, %32, %34 : vector<19x19xi32>
      %c16_i32_20 = arith.constant 16 : i32
      %36 = vector.broadcast %c16_i32_20 : i32 to vector<19x19xi32>
      %37 = arith.cmpi slt, %33, %36 : vector<19x19xi32>
      %c16_i32_21 = arith.constant 16 : i32
      %38 = vector.broadcast %c16_i32_21 : i32 to vector<19x19xi32>
      %39 = arith.cmpi sge, %32, %38 : vector<19x19xi32>
      %c18_i32 = arith.constant 18 : i32
      %40 = vector.broadcast %c18_i32 : i32 to vector<19x19xi32>
      %41 = arith.cmpi slt, %32, %40 : vector<19x19xi32>
      %42 = arith.andi %39, %41 : vector<19x19xi1>
      %c16_i32_22 = arith.constant 16 : i32
      %43 = vector.broadcast %c16_i32_22 : i32 to vector<19x19xi32>
      %44 = arith.cmpi sge, %33, %43 : vector<19x19xi32>
      %c18_i32_23 = arith.constant 18 : i32
      %45 = vector.broadcast %c18_i32_23 : i32 to vector<19x19xi32>
      %46 = arith.cmpi slt, %33, %45 : vector<19x19xi32>
      %47 = arith.andi %44, %46 : vector<19x19xi1>
      %48 = arith.andi %35, %37 : vector<19x19xi1>
      %cst_24 = arith.constant 1.000000e+00 : f32
      %cst_25 = arith.constant 0.000000e+00 : f32
      %49 = vector.broadcast %cst_24 : f32 to vector<19x19xf32>
      %50 = vector.broadcast %cst_25 : f32 to vector<19x19xf32>
      %51 = arith.select %48, %49, %50 : vector<19x19xi1>, vector<19x19xf32>
      %52 = arith.andi %42, %47 : vector<19x19xi1>
      %cst_26 = arith.constant 1.000000e+00 : f32
      %cst_27 = arith.constant 0.000000e+00 : f32
      %53 = vector.broadcast %cst_26 : f32 to vector<19x19xf32>
      %54 = vector.broadcast %cst_27 : f32 to vector<19x19xf32>
      %55 = arith.select %52, %53, %54 : vector<19x19xi1>, vector<19x19xf32>
      %56 = arith.addf %51, %55 : vector<19x19xf32>
      %57 = arith.andi %35, %47 : vector<19x19xi1>
      %cst_28 = arith.constant 1.000000e+00 : f32
      %cst_29 = arith.constant 0.000000e+00 : f32
      %58 = vector.broadcast %cst_28 : f32 to vector<19x19xf32>
      %59 = vector.broadcast %cst_29 : f32 to vector<19x19xf32>
      %60 = arith.select %57, %58, %59 : vector<19x19xi1>, vector<19x19xf32>
      %61 = arith.subf %56, %60 : vector<19x19xf32>
      %62 = arith.andi %42, %37 : vector<19x19xi1>
      %cst_30 = arith.constant 1.000000e+00 : f32
      %cst_31 = arith.constant 0.000000e+00 : f32
      %63 = vector.broadcast %cst_30 : f32 to vector<19x19xf32>
      %64 = vector.broadcast %cst_31 : f32 to vector<19x19xf32>
      %65 = arith.select %62, %63, %64 : vector<19x19xi1>, vector<19x19xf32>
      %66 = arith.subf %61, %65 : vector<19x19xf32>
      %67 = arith.mulf %66, %31 : vector<19x19xf32>
      %68 = arith.mulf %67, %31 : vector<19x19xf32>
      %69 = vector.shape_cast %68 : vector<19x19xf32> to vector<1x19x19xf32>
      %cst_32 = arith.constant dense<0.000000e+00> : vector<1xf32>
      %70 = vector.multi_reduction <add>, %69, %cst_32 [1, 2] : vector<1x19x19xf32> to vector<1xf32>
      %71 = vector.shape_cast %70 : vector<1xf32> to vector<1x1x1xf32>
      %72 = vector.extract %71[0, 0, 0] : f32 from vector<1x1x1xf32>
      %73 = tpu.iota {dimensions = array<i32: 0>} : vector<19x19xi32>
      %74 = tpu.iota {dimensions = array<i32: 1>} : vector<19x19xi32>
      %c18_i32_33 = arith.constant 18 : i32
      %75 = vector.broadcast %c18_i32_33 : i32 to vector<19x19xi32>
      %76 = arith.cmpi eq, %73, %75 : vector<19x19xi32>
      %c18_i32_34 = arith.constant 18 : i32
      %77 = vector.broadcast %c18_i32_34 : i32 to vector<19x19xi32>
      %78 = arith.cmpi eq, %74, %77 : vector<19x19xi32>
      %79 = arith.andi %76, %78 : vector<19x19xi1>
      %cst_35 = arith.constant 0.000000e+00 : f32
      %80 = vector.broadcast %cst_35 : f32 to vector<19x19xf32>
      %81 = arith.select %79, %31, %80 : vector<19x19xi1>, vector<19x19xf32>
      %82 = vector.shape_cast %81 : vector<19x19xf32> to vector<1x19x19xf32>
      %cst_36 = arith.constant dense<0.000000e+00> : vector<1xf32>
      %83 = vector.multi_reduction <add>, %82, %cst_36 [1, 2] : vector<1x19x19xf32> to vector<1xf32>
      %84 = vector.shape_cast %83 : vector<1xf32> to vector<1x1x1xf32>
      %85 = vector.extract %84[0, 0, 0] : f32 from vector<1x1x1xf32>
      %cst_37 = arith.constant 1.000000e+00 : f32
      %86 = arith.maximumf %85, %cst_37 : f32
      %87 = arith.divf %72, %86 : f32
      %88 = vector.broadcast %87 : f32 to vector<1x1x1xf32>
      %c0_38 = arith.constant 0 : index
      %c0_39 = arith.constant 0 : index
      %c0_40 = arith.constant 0 : index
      %89 = vector.load %arg6[%c0_38, %c0_39, %c0_40] : memref<1x1x1xf32, #tpu.memory_space<vmem>>, vector<1x1x1xf32>
      tpu.vector_store %arg6[%c0_38, %c0_39, %c0_40], %88 {strides = array<i32>} : memref<1x1x1xf32, #tpu.memory_space<vmem>>, vector<1x1x1xf32>,
    } else {
    }
    return
  }
  func.func @transform_0(%arg0: i32, %arg1: i32) -> (i32, i32) {
    %c0_i32 = arith.constant 0 : i32
    %c0_i32_0 = arith.constant 0 : i32
    %c0_i32_1 = arith.constant 0 : i32
    return %c0_i32, %c0_i32_0 : i32, i32
  }
  func.func @transform_1(%arg0: i32, %arg1: i32) -> (i32, i32, i32) {
    %c0_i32 = arith.constant 0 : i32
    %c0_i32_0 = arith.constant 0 : i32
    return %arg0, %c0_i32, %arg1 : i32, i32, i32
  }
  func.func @transform_2(%arg0: i32, %arg1: i32) -> (i32, i32, i32) {
    %c0_i32 = arith.constant 0 : i32
    %c0_i32_0 = arith.constant 0 : i32
    return %arg0, %c0_i32, %arg1 : i32, i32, i32
  }
  func.func @transform_3(%arg0: i32, %arg1: i32) -> (i32, i32, i32) {
    %c0_i32 = arith.constant 0 : i32
    %c0_i32_0 = arith.constant 0 : i32
    return %arg0, %c0_i32, %arg1 : i32, i32, i32
  }
  func.func @transform_4(%arg0: i32, %arg1: i32) -> (i32, i32, i32) {
    %c0_i32 = arith.constant 0 : i32
    %c0_i32_0 = arith.constant 0 : i32
    %c0_i32_1 = arith.constant 0 : i32
    return %arg0, %c0_i32, %c0_i32_0 : i32, i32, i32
  }
}

</mosaic_0001>

<bundles_post_ra>
// kernel: tpu_custom_call.1
= control target key start
LH: loop header
LB: loop body
LE: loop exit
PB: predicated region body
PF: predicated region fallthrough
CT: control target
= control target key end

     0   :  { %s1079_s0 = inlined_call_operand.<no memory space> [shape: f32[1,1], index: 0, kind: input, shape index: {}]   ;;  %s1080_s1 = inlined_call_operand.hbm [shape: bf16[2,16,256], index: 1, kind: input, shape index: {}]   ;;  %s1081_s2 = inlined_call_operand.hbm [shape: s32[2,1,256], index: 2, kind: input, shape index: {}]   ;;  %s1082_s3 = inlined_call_operand.vmem [shape: f32[2,1,256], index: 3, kind: input, shape index: {}]   ;;  %s1083_s4 = inlined_call_operand.vmem [shape: f32[2,1,1], index: 4, kind: output, shape index: {}]  }
   0x1   :  { %9 = sst [smem:[#allocation3]] %s1079_s0 }
   0x2   :  { %10 = vsyncpa [#allocation5], 0 }
   0x3   :  { %12 = vsyncpa [#allocation5 + $0x1], 0 }
   0x4   :  { %13 = vsyncpa [#allocation7], 0 }
   0x5   :  { %15 = vsyncpa [#allocation7 + $0x1], 0  ;;  %s924_s17 = smov 0   ;;  %s926_s18 = smov 0  }
   0x6   :  { %s928_s19 = smov 0   ;;  %s930_s20 = smov 0  }
   0x7   :  { %s932_s21 = smov 0   ;;  %s934_s22 = smov 0  }
   0x8 LB: > { %s679_s0 = sadd.s32 4294967295, %s888_s22   ;;  %s33_s23 = sadd.s32 1, %s884_s21  ;;  %s888_s22 = sphi %s934_s22, %s21_s22   ;;  %s884_s21 = sphi %s932_s21, %s1092_s21   ;;  %s880_s20 = sphi %s930_s20, %s1091_s20   ;;  %s876_s19 = sphi %s928_s19, %s1090_s19   ;;  %s872_s18 = sphi %s926_s18, %s1089_s18   ;;  %s868_s17 = sphi %s924_s17, %s1088_s17  }
   0x9   : > { %p35_p0 = scmp.ge.s32.totalorder %s33_s23, 2  ;;  %s63_s24 = sadd.s32 1, %s876_s19 }
   0xa   : > { %p70_p1 = scmp.ne.s32.totalorder %s876_s19, %s872_s18  ;;  %p71_p2 = scmp.eq.s32.totalorder %s888_s22, 0 }
   0xb   : > { %s1094_s23 = smov (%p35_p0, %s33_s23), 0  ;;  %p76_p4 = scmp.ne.s32.totalorder %s872_s18, %s868_s17 }
   0xc   : > { %p960_p3 = por %p71_p2, %p70_p1  ;;  %s58_s26 = ssub.s32 %s884_s21, %s1094_s23 }
   0xd   : > { %p77_p5 = scmp.eq.s32.totalorder %s679_s0, 0  ;;  %p61_p6 = scmp.eq.s32.totalorder %s58_s26, 0 }
   0xe   : > { %p723_p8 = scmp.lt.s32.totalorder %s888_s22, 2  ;;  %s976_s29 = sand.u32 1, %s876_s19  }
   0xf   : > { %p967_p7 = por %p77_p5, %p76_p4  ;;  %s698_s30 = sshll.u32 %s884_s21, 8 }
  0x10   : > { %s973_s28 = scalar_select %p61_p6, %s876_s19, %s63_s24  }
  0x11   : > { %s683_s5 = sshll.u32 %s976_s29, 4  ;;  %s197_s8 = scalar_lea.hbm %s1080_s1, %s698_s30 }
  0x12   : > { %s189_s9 = scalar_lea.vmem [#allocation4], %s683_s5  ;;  %p985_p9 = pnand %p723_p8, %p960_p3 }
  0x13   : > { %s198_s10 = sshll.u32 %s189_s9, 4  ;;  %s186_s12 = scalar_lea.sflag [#allocation5], %s976_s29  ;;  %s199_s10 = int_to_ptr.vmem [resolvable:$true] %s198_s10 }
  0x14   : > { %p780_p10 = pneg %p985_p9  ;;  %s791_s13 = scalar_lea.vmem %s199_s10, 256 }
  0x15   : > { %p792_p11 = scmp.ne.s32.totalorder %s199_s10, %s791_s13  ;;  %s890_s14 = smov [#allocation4]  }
  0x16   : > { %s796_s15 = sshll.u32 %s890_s14, 4  ;;  %s797_s15 = int_to_ptr.vmem [resolvable:$false] %s796_s15 }
  0x17   : > { %p794_p12 = pnand %p792_p11, %p780_p10  ;;  %s798_s16 = scalar_lea.vmem %s797_s15, 512 }
  0x18   : > { %p799_p0 = scmp.lt.s32.totalorder %s199_s10, %s797_s15  ;;  %p800_p1 = scmp.lt.s32.totalorder %s798_s16, %s791_s13 }
  0x19   : > { %p795_p13 = pneg %p794_p12 }
  0x1a   : > { %p801_p2 = por %p800_p1, %p799_p0 }
  0x1c   : > { %p802_p3 = pnand %p801_p2, %p795_p13 }
  0x1e   : > { %805 = shalt.err (!%p802_p3)
}
  0x1f   : > { %s891_s17 = smov 128   ;;  %s892_s0 = smov 8  }
  0x20   : > { %719 = dma.hbm_to_vmem [thread:$0]  (!%p985_p9), %s197_s8, 256, %s199_s10, %s186_s12, %s891_s17, %s891_s17, %s892_s0  }
  0x21   : > { %p689_p4 = scmp.ge.s32.totalorder %s888_s22, 1  ;;  %p239_p5 = scmp.lt.s32.totalorder %s888_s22, 3 }
  0x22   : > { %s686_s24 = sshll.u32 %s976_s29, 1  ;;  %s699_s26 = sshll.u32 %s884_s21, 5 }
  0x23   : > { %p1000_p6 = pnand %p689_p4, %p239_p5  ;;  %s212_s30 = scalar_lea.vmem [#allocation6], %s686_s24 }
  0x24   : > { %s222_s5 = sshll.u32 %s212_s30, 4  ;;  %s220_s9 = scalar_lea.hbm %s1081_s2, %s699_s26  ;;  %s223_s5 = int_to_ptr.vmem [resolvable:$true] %s222_s5 }
  0x25   : > { %s209_s13 = scalar_lea.sflag [#allocation7], %s976_s29  ;;  %s819_s14 = scalar_lea.vmem %s223_s5, 32 }
  0x26   : > { %p820_p8 = scmp.ne.s32.totalorder %s223_s5, %s819_s14  ;;  %s893_s8 = smov [#allocation6]  }
  0x27   : > { %s824_s10 = sshll.u32 %s893_s8, 4  ;;  %s825_s10 = int_to_ptr.vmem [resolvable:$false] %s824_s10 }
  0x28   : > { %p822_p11 = pnand %p820_p8, %p780_p10  ;;  %s826_s12 = scalar_lea.vmem %s825_s10, 64 }
  0x29   : > { %p827_p13 = scmp.lt.s32.totalorder %s223_s5, %s825_s10  ;;  %p828_p0 = scmp.lt.s32.totalorder %s826_s12, %s819_s14 }
  0x2a   : > { %p823_p12 = pneg %p822_p11 }
  0x2b   : > { %p829_p1 = por %p828_p0, %p827_p13 }
  0x2d   : > { %p830_p2 = pnand %p829_p1, %p823_p12 }
  0x2f   : > { %833 = shalt.err (!%p830_p2)
}
  0x30   : > { %722 = dma.hbm_to_vmem [thread:$0]  (!%p985_p9), %s220_s9, 32, %s223_s5, %s209_s13  }
  0x31   : > { %243 = sbr.rel (%p1000_p6) target bundleno = 572 (0x23c), region = 36  ;;  %s245_s29 = sand.u32 (!%p1000_p6), 1, %s872_s18  }
  0x32   : > { %s690_s15 = sshll.u32 (!%p1000_p6), %s245_s29, 4  ;;  %s246_s16 = scalar_lea.sflag (!%p1000_p6), [#allocation5], %s245_s29 }
  0x33   : > { %s1017_s17 = scalar_lea.vmem (!%p1000_p6), [#allocation4], %s690_s15 }
  0x36   : > { %859 = dma.done.wait (%p967_p7), %s246_s16, 256  }
  0x37   : > { %861 = vsyncadd (%p967_p7), %s246_s16, 4294967040  ;;  %s691_s0 = sshll.u32 %s245_s29, 1  ;;  %s255_s24 = scalar_lea.sflag [#allocation7], %s245_s29 }
  0x38   : > { %s258_s11 = scalar_lea.vmem [#allocation6], %s691_s0 }
  0x39   : > { %863 = dma.done.wait (%p967_p7), %s255_s24, 32  }
  0x3a   : > { %865 = vsyncadd (%p967_p7), %s255_s24, 4294967264  ;;  %p297_p9 = scmp.lt.s32.totalorder %s880_s20, 1  ;;  %v325_v0 = vlaneseq  ;;  %vm312_vm0 = vcmask 154624   ;;  %s341_s25 = sld [smem:[#allocation3]]  ;;  %v894_v1 = vmov 0.0   ;;  %v318_v8 = vld [vmem:[%s1017_s17 + $0x8] sm:$0xff] }
  0x3b   : > { %313 = vst.msk [vmem:[#allocation2] sm:$0xff] %vm312_vm0, %v894_v1  ;;  %314 = vst.msk [vmem:[#allocation2 + $0x8] sm:$0xff] %vm312_vm0, %v894_v1  ;;  %v323_v5 = vld [vmem:[%s258_s11] sm:$0x3]  ;;  %v322_v11 = vunpack.c.h.bf16 %v318_v8  ;;  %vm346_vm2 = vcmask 1041408   ;;  %v321_v18 = vunpack.c.l.bf16 %v318_v8  ;;  %vm315_vm5 = vcmask 149504  }
  0x3c   : > { %s1096_s20 = smov (!%p297_p9, %s880_s20), 1  ;;  %v326_v2 = vshrl.u32 %v325_v0, 7  ;;  %v317_v13 = vld [vmem:[%s1017_s17] sm:$0xff]  ;;  %316 = vst.msk [vmem:[#allocation2 + $0x10] sm:$0x7] %vm315_vm5, %v894_v1  ;;  %v466_v29 = vand.u32 127, %v325_v0 }
  0x3d   : > { %s692_s27 = sshll.u32 %s1096_s20, 1  ;;  %v320_v22 = vunpack.c.h.bf16 %v317_v13  ;;  %v319_v27 = vunpack.c.l.bf16 %v317_v13  ;;  %s895_s9 = smov 1.0  }
  0x3e   : > { %v333_v3 = vsub.s32 1, %v326_v2  ;;  %v329_v4 = vsub.s32 0, %v326_v2  ;;  %s303_s5 = scalar_lea.vmem %s1082_s3, %s692_s27  ;;  %v464_v30 = vadd.s32 16, %v326_v2  ;;  %vm480_vm6 = vcmp.ge.s32.totalorder %v466_v29, 16  ;;  %s307_s12 = scalar_lea.vmem %s1083_s4, %s1096_s20 }
  0x3f   : > { %v324_v6 = vld [vmem:[%s303_s5] sm:$0x3]  ;;  %vm481_vm7 = vcmp.lt.s32.totalorder %v466_v29, 18  ;;  %vm470_vm8 = vcmp.lt.s32.totalorder %v466_v29, 16  ;;  %vm539_vm14 = vcmp.eq.s32.totalorder %v466_v29, 18 }
  0x40   : > { %v342_v7 = vstv %s341_s25  ;;  %v334_v9 = vrot.slane %v323_v5, %v333_v3  ;;  %v330_v10 = vrot.slane %v323_v5, %v329_v4  ;;  %vm476_vm9 = vcmp.lt.s32.totalorder %v464_v30, 18  ;;  %vm482_vm10 = vmand %vm480_vm6, %vm481_vm7 }
  0x41   : > { %vm343_vm1 = vcmp.gt.f32.partialorder %v324_v6, %v342_v7  ;;  %v486_v41 = vsel %vm470_vm8, 1.0, %v894_v1  ;;  %vm491_vm11 = vmand %vm476_vm9, %vm482_vm10  ;;  %v501_v42 = vsel %vm482_vm10, 1.0, %v894_v1  ;;  %vm538_vm13 = vcmp.eq.s32.totalorder %v464_v30, 18 }
  0x42   : > { %v695_v12 = vsel %vm343_vm1, 1.0, %v894_v1  ;;  %vm336_vm3 = vcmp.eq.s32.totalorder %v334_v9, %v326_v2  ;;  %vm335_vm4 = vcmp.eq.s32.totalorder %v330_v10, %v326_v2  ;;  %v366_v31 = vld [vmem:[#allocation2] sm:$0xff]  ;;  %v367_v32 = vld [vmem:[#allocation2 + $0x8] sm:$0xff]  ;;  %vm509_vm12 = vmand %vm476_vm9, %vm470_vm8  ;;  %v504_v45 = vsub.f32 %v486_v41, %v501_v42 }
  0x43   : > { %v357_v14 = vrot.slane %v695_v12, %v333_v3  ;;  %v353_v15 = vrot.slane %v695_v12, %v329_v4  ;;  %v694_v16 = vsel %vm336_vm3, 1.0, %v894_v1  ;;  %v693_v17 = vsel %vm335_vm4, 1.0, %v894_v1  ;;  %v368_v39 = vld [vmem:[#allocation2 + $0x10] sm:$0x7]  ;;  %vm542_vm15 = vmand %vm538_vm13, %vm539_vm14 }
  0x44   : > { %v348_v19 = vsel %vm346_vm2, %v694_v16, 1.0  ;;  %v347_v20 = vsel %vm346_vm2, %v693_v17, 1.0  ;;  %v494_v46 = vsel %vm491_vm11, 1.0, %v894_v1  ;;  %v512_v47 = vsel %vm509_vm12, 1.0, %v894_v1 }
  0x45   : > { %v363_v21 = vmul.f32 %v357_v14, %v322_v11  ;;  %v365_v23 = vmul.f32 %v357_v14, %v348_v19  ;;  %v364_v24 = vmul.f32 %v353_v15, %v347_v20  ;;  %v362_v25 = vmul.f32 %v353_v15, %v321_v18 }
  0x46   : > { %v361_v26 = vmul.f32 %v357_v14, %v320_v22  ;;  %v360_v28 = vmul.f32 %v353_v15, %v319_v27  ;;  %v515_v50 = vsub.f32 %v494_v46, %v512_v47 }
  0x47   : > { %438 = vmatprep.mubr.f32.mxu1 %v363_v21  ;;  %395 = vmatprep.subr.mxu0 %v365_v23 }
  0x48   : > { %700 = vmatprep.subr.mxu1 %v365_v23  ;;  %396 = vmatpush1.xpose.msra.mxu0 %v364_v24 }
  0x49   : > { %703 = vmatpush1.xpose.msra.mxu1 %v364_v24  ;;  %397 = vmatprep.subr.mxu0 %v363_v21 }
  0x4a   : > { %701 = vmatprep.subr.mxu1 %v363_v21  ;;  %433 = vmatprep.mubr.f32.mxu0 %v361_v26 }
  0x4c   : > { %398 = vmatpush1.xpose.msra.mxu0 %v362_v25 }
  0x4d   : > { %704 = vmatpush1.xpose.msra.mxu1 %v362_v25  ;;  %399 = vmatprep.subr.mxu0 %v361_v26 }
  0x4e   : > { %702 = vmatprep.subr.mxu1 %v361_v26 }
  0x50   : > { %400 = vmatpush1.xpose.msra.mxu0 %v360_v28 }
  0x51   : > { %705 = vmatpush1.xpose.msra.mxu1 %v360_v28 }
  0x53   : > { %434 = vmatmul.mubr.f32.vlgmr.msra.gmra.mxu0 %v360_v28 }
  0x54   : > { %439 = vmatmul.mubr.f32.vlgmr.msra.gmra.mxu1 %v362_v25 }
  0x55   : > { %443 = vmatprep.mubr.f32.mxu1 %v365_v23 }
  0x58   : > { %444 = vmatmul.mubr.f32.gmra.mxu1 %v364_v24 }
 0x113   : > { %v435_v33 = vpop.f32.mrf.mxu0 }
 0x114   : > { %v440_v34 = vpop.f32.mrf.mxu1  ;;  %v449_v35 = vadd.f32 %v435_v33, %v366_v31 }
 0x115   : > { %v450_v36 = vadd.f32 %v440_v34, %v367_v32  ;;  %v437_v37 = vpop.f32.mrf.mxu0 }
 0x116   : > { %v442_v38 = vpop.f32.mrf.mxu1  ;;  %453 = vst.msk [vmem:[#allocation2] sm:$0xff] %vm312_vm0, %v449_v35 }
 0x117   : > { %454 = vst.msk [vmem:[#allocation2 + $0x8] sm:$0xff] %vm312_vm0, %v450_v36 }
 0x118   : > { %v445_v40 = vpop.f32.mrf.mxu1 }
 0x119   : > { %v451_v43 = vadd.f32 %v445_v40, %v368_v39 }
 0x11a   : > { %v447_v44 = vpop.f32.mrf.mxu1 }
 0x11b   : > { %456 = vst.msk [vmem:[#allocation2 + $0x10] sm:$0x7] %vm315_vm5, %v451_v43 }
 0x11d   : > { %v460_v48 = vld [vmem:[#allocation2] sm:$0xff] }
 0x11e   : > { %v461_v49 = vld [vmem:[#allocation2 + $0x8] sm:$0xff]  ;;  %v516_v51 = vmul.f32 %v504_v45, %v460_v48 }
 0x11f   : > { %v517_v52 = vmul.f32 %v504_v45, %v461_v49 }
 0x120   : > { %v519_v53 = vmul.f32 %v516_v51, %v460_v48 }
 0x121   : > { %v520_v54 = vmul.f32 %v517_v52, %v461_v49 }
 0x122   : > { %v462_v55 = vld [vmem:[#allocation2 + $0x10] sm:$0x7]  ;;  %v522_v57 = vsel %vm312_vm0, %v519_v53, 0.0 }
 0x123   : > { %v518_v56 = vmul.f32 %v515_v50, %v462_v55  ;;  %v523_v58 = vsel %vm312_vm0, %v520_v54, 0.0  ;;  %v545_v63 = vsel %vm542_vm15, %v462_v55, 0.0  ;;  %vm566_vm0 = vcmask 0  }
 0x124   : > { %v524_v60 = vadd.f32 %v523_v58, %v522_v57  ;;  %v549_v0 = vsel %vm315_vm5, %v545_v63, 0.0 }
 0x125   : > { %v521_v59 = vmul.f32 %v518_v56, %v462_v55 }
 0x127   : > { %v525_v61 = vsel %vm315_vm5, %v521_v59, 0.0 }
 0x128   : > { %v526_v62 = vadd.f32 %v525_v61, %v524_v60 }
 0x12a   : > { %527 = vadd.xlane.f32.xlu0 %v526_v62 }
 0x12e   : > { %551 = vadd.xlane.f32.xlu0 %v549_v0 }
 0x1b3   : > { %v528_v1 = vpop.xlane.xlu0 %527 }
 0x1b4   : > { %v529_v2 = vrot.slane %v528_v1, 4 }
 0x1b6   : > { %v530_v3 = vadd.f32 %v529_v2, %v528_v1 }
 0x1b7   : > { %v552_v4 = vpop.xlane.xlu0 %551 }
 0x1b8   : > { %v531_v5 = vrot.slane %v530_v3, 2  ;;  %v553_v6 = vrot.slane %v552_v4, 4 }
 0x1ba   : > { %v554_v7 = vadd.f32 %v553_v6, %v552_v4  ;;  %v532_v8 = vadd.f32 %v531_v5, %v530_v3 }
 0x1bc   : > { %v555_v9 = vrot.slane %v554_v7, 2  ;;  %v533_v10 = vrot.slane %v532_v8, 1 }
 0x1be   : > { %v556_v11 = vadd.f32 %v555_v9, %v554_v7  ;;  %v534_v12 = vadd.f32 %v533_v10, %v532_v8 }
 0x1c0   : > { %706 = vpush %v534_v12  ;;  %v557_v13 = vrot.slane %v556_v11, 1 }
 0x1c2   : > { %v558_v14 = vadd.f32 %v557_v13, %v556_v11 }
 0x1c4   : > { %708 = vpush %v558_v14 }
 0x1f1   : > { %s707_s6 = spop %706 }
 0x1f5   : > { %s709_s7 = spop %708 }
 0x1f6   : > { %s560_s13 = smax.f32 %s895_s9, %s709_s7 }
 0x1f7   : > { %v561_v15 = vstv %s560_s13 }
 0x1f8   : > { %776 = vrcp.f32 %v561_v15 }
 0x205   : > { %v777_v16 = vpop.eup %776 }
 0x206   : > { %710 = vpush %v777_v16 }
 0x237   : > { %s711_s14 = spop %710 }
 0x238   : > { %s564_s29 = smul.f32 %s711_s14, %s707_s6 }
 0x23a   : > { %v565_v17 = vstv %s564_s29 }
 0x23b   : > { %567 = vst.msk [vmem:[%s307_s12] sm:$0x1] %vm566_vm0, %v565_v17 }
 0x23c PF: > { %s21_s22 = sadd.s32 1, %s888_s22   ;;  %s1088_s17 = smov %s872_s18 }
 0x23d   : > { %p18_p7 = scmp.ge.s32.totalorder %s21_s22, 4   ;;  %s1089_s18 = smov %s876_s19 }
 0x23e   : > { %s1090_s19 = smov %s973_s28  ;;  %s1091_s20 = smov %s884_s21 }
 0x23f   : > { %s1092_s21 = smov %s1094_s23  ;;  %20 = sbr.rel (!%p18_p7) target bundleno = 8 (0x8), region = 100 }
 0x244   :  { %585 = vsyncpa [#allocation5], 1 }
 0x245   :  { %587 = vsyncpa [#allocation5 + $0x1], 1 }
 0x246   :  { %588 = vsyncpa [#allocation7], 1 }
 0x247   :  { %590 = vsyncpa [#allocation7 + $0x1], 1 }

</bundles_post_ra>
